<compile_context>
chip_gen: v7x
topology: tpu7x:2x2x1
jax: 0.10.0
libtpu: 0.0.40
codegen_flags: <defaults>
</compile_context>

<pallas_src>
import functools

import jax
import jax.numpy as jnp
from jax.experimental import pallas as pl
from jax.experimental.pallas import tpu as pltpu


# ----------------------------------------------------------------------------
# Kernel
# ----------------------------------------------------------------------------
def _fusion_kernel(v_ref, l_ref, wi_ref, wt_ref, b_ref, o_ref, *, activation):
    # (tm, Ki) @ (Ki, tn) and (tm, Kw) @ (Kw, tn): f32 accumulation on the MXU.
    acc = jnp.dot(v_ref[...], wi_ref[...], preferred_element_type=jnp.float32)
    acc = acc + jnp.dot(l_ref[...], wt_ref[...], preferred_element_type=jnp.float32)
    acc = acc + b_ref[...].astype(jnp.float32)      # (1, tn) broadcasts over rows
    if activation == "tanh":
        acc = jnp.tanh(acc)                         # EUP transcendental (free slot)
    elif activation == "relu":
        acc = jnp.maximum(acc, 0.0)
    o_ref[...] = acc.astype(o_ref.dtype)


# ----------------------------------------------------------------------------
# Parameter preparation (one-time, OUTSIDE the per-forward hot path)
# ----------------------------------------------------------------------------
def _round_up(x, m):
    return ((x + m - 1) // m) * m


def _pack_params(wi_t, wt_t, bias, img_dim, word_dim, compute_dtype):
    n_pad = _round_up(img_dim, 128)   # output/lane axis -> dense stores
    ki_pad = _round_up(img_dim, 8)    # K of the vecs matmul (sublane aligned)
    kw_pad = _round_up(word_dim, 8)   # K of the labels matmul

    wi_t = jnp.pad(wi_t, ((0, ki_pad - img_dim), (0, n_pad - img_dim)))
    wt_t = jnp.pad(wt_t, ((0, kw_pad - word_dim), (0, n_pad - img_dim)))
    bias2d = jnp.pad(bias.reshape(1, img_dim), ((0, 0), (0, n_pad - img_dim)))

    if compute_dtype is not None:
        wi_t = wi_t.astype(compute_dtype)
        wt_t = wt_t.astype(compute_dtype)

    return {
        "wi_t": wi_t, "wt_t": wt_t, "bias": bias2d,
        "img_dim": img_dim, "word_dim": word_dim,
        "n_pad": n_pad, "ki_pad": ki_pad, "kw_pad": kw_pad,
        "compute_dtype": compute_dtype,
    }


def prepare_concat_params(weight, bias, img_dim, word_dim, *, compute_dtype=None):
    """method='concatenate': weight [img, img+word] (nn.Linear layout), bias [img]."""
    assert weight.shape == (img_dim, img_dim + word_dim)
    wi_t = jnp.transpose(weight[:, :img_dim])     # [img, img]
    wt_t = jnp.transpose(weight[:, img_dim:])     # [word, img]
    return _pack_params(wi_t, wt_t, bias, img_dim, word_dim, compute_dtype)


def prepare_add_params(w_i, w_t, img_dim, word_dim, *, compute_dtype=None):
    """method='add': W_i [img, img], W_t [img, word], no bias."""
    assert w_i.shape == (img_dim, img_dim) and w_t.shape == (img_dim, word_dim)
    bias = jnp.zeros((img_dim,), jnp.float32)
    return _pack_params(jnp.transpose(w_i), jnp.transpose(w_t),
                        bias, img_dim, word_dim, compute_dtype)


# ----------------------------------------------------------------------------
# Forward wrapper
# ----------------------------------------------------------------------------
def fusion_layer(vecs, labels, params, *, activation="tanh",
                 batch_tile=None, n_tile=None):
    """vecs: [B, img_dim], labels: [B, word_dim], params from prepare_*_params."""
    B, img_dim = vecs.shape
    _, word_dim = labels.shape
    assert img_dim == params["img_dim"] and word_dim == params["word_dim"]

    n_pad, ki_pad, kw_pad = params["n_pad"], params["ki_pad"], params["kw_pad"]
    cdt = params["compute_dtype"]
    out_dtype = vecs.dtype

    # ---- tile choices -------------------------------------------------------
    tm = batch_tile or min(256, _round_up(B, 8))
    tm = _round_up(min(tm, _round_up(B, 8)), 8)
    b_pad = _round_up(B, tm)

    if n_tile is not None:
        tn = n_tile
    else:
        tn = 512 if n_pad % 512 == 0 else (256 if n_pad % 256 == 0 else 128)
    assert n_pad % tn == 0 and tn % 128 == 0

    gm, gn = b_pad // tm, n_pad // tn

    # ---- pad activations (no-op when already aligned) -----------------------
    v = vecs
    if (b_pad, ki_pad) != (B, img_dim):
        v = jnp.pad(v, ((0, b_pad - B), (0, ki_pad - img_dim)))
    l = labels
    if (b_pad, kw_pad) != (B, word_dim):
        l = jnp.pad(l, ((0, b_pad - B), (0, kw_pad - word_dim)))
    if cdt is not None:
        v = v.astype(cdt)
        l = l.astype(cdt)

    wi_t, wt_t, bias2d = params["wi_t"], params["wt_t"], params["bias"]

    act_b = jnp.dtype(v.dtype).itemsize
    w_b = jnp.dtype(wi_t.dtype).itemsize
    out_b = jnp.dtype(out_dtype).itemsize

    # ---- grid loop-order heuristic: minimize total HBM read traffic ---------
    # Inner-axis block indices that don't change are not re-DMA'd, so the
    # operand indexed only by the OUTER axis streams through HBM exactly once.
    w_bytes = (ki_pad + kw_pad) * n_pad * w_b
    a_bytes = b_pad * (ki_pad + kw_pad) * act_b
    batch_major = (a_bytes + gm * w_bytes) <= (w_bytes + gn * a_bytes)

    if batch_major:                       # i (batch) outer, j (features) inner
        grid = (gm, gn)
        act_map = lambda i, j: (i, 0)
        w_map = lambda i, j: (0, j)
        b_map = lambda i, j: (0, j)
        o_map = lambda i, j: (i, j)
    else:                                 # j (features) outer, i (batch) inner
        grid = (gn, gm)
        act_map = lambda j, i: (i, 0)
        w_map = lambda j, i: (0, j)
        b_map = lambda j, i: (0, j)
        o_map = lambda j, i: (i, j)

    # ---- VMEM budget: 2 pipeline buffers per operand, plus headroom ---------
    tile_bytes = (tm * ki_pad * act_b + tm * kw_pad * act_b
                  + ki_pad * tn * w_b + kw_pad * tn * w_b
                  + tn * 4 + tm * tn * out_b)
    vmem_limit = int(min(max(2 * tile_bytes * 3 // 2 + (2 << 20), 16 << 20), 64 << 20))

    # ---- cost estimate for the XLA scheduler --------------------------------
    flops = 2 * b_pad * n_pad * (ki_pad + kw_pad)
    transcendentals = b_pad * n_pad if activation == "tanh" else 0
    bytes_accessed = (b_pad * ki_pad * act_b + b_pad * kw_pad * act_b
                      + ki_pad * n_pad * w_b + kw_pad * n_pad * w_b
                      + n_pad * 4 + b_pad * n_pad * out_b)

    kernel = functools.partial(_fusion_kernel, activation=activation)

    out_padded = pl.pallas_call(
        kernel,
        out_shape=jax.ShapeDtypeStruct((b_pad, n_pad), out_dtype),
        grid_spec=pltpu.PrefetchScalarGridSpec(
            num_scalar_prefetch=0,
            grid=grid,
            in_specs=[
                pl.BlockSpec((tm, ki_pad), act_map),   # vecs tile
                pl.BlockSpec((tm, kw_pad), act_map),   # labels tile
                pl.BlockSpec((ki_pad, tn), w_map),     # Wi^T N-tile
                pl.BlockSpec((kw_pad, tn), w_map),     # Wt^T N-tile
                pl.BlockSpec((1, tn), b_map),          # bias N-tile
            ],
            out_specs=pl.BlockSpec((tm, tn), o_map),
        ),
        compiler_params=pltpu.CompilerParams(
            dimension_semantics=("parallel", "parallel"),
            vmem_limit_bytes=vmem_limit,
        ),
        cost_estimate=pl.CostEstimate(
            flops=flops, transcendentals=transcendentals,
            bytes_accessed=bytes_accessed),
    )(v, l, wi_t, wt_t, bias2d)

    # Slice away batch / feature padding.
    return out_padded[:B, :img_dim]


# ----------------------------------------------------------------------------
# Demo / correctness check
# ----------------------------------------------------------------------------
if __name__ == "__main__":
    B, IMG, WORD = 8, 32, 16
    key = jax.random.PRNGKey(0)
    k_v, k_l, k_w, k_b, k_wi, k_wt = jax.random.split(key, 6)

    vecs = jax.random.normal(k_v, (B, IMG), dtype=jnp.float32)
    labels = jax.random.normal(k_l, (B, WORD), dtype=jnp.float32)

    # ---- method='concatenate', activation='tanh' ----------------------------
    fan_in = IMG + WORD
    bound = 1.0 / (fan_in ** 0.5)
    weight = jax.random.uniform(k_w, (IMG, fan_in), minval=-bound, maxval=bound,
                                dtype=jnp.float32)
    bias = jax.random.uniform(k_b, (IMG,), minval=-bound, maxval=bound,
                              dtype=jnp.float32)
    # One-time parameter prep (split + transpose + pad) outside the hot path.
    # For production on v5e/v6e pass compute_dtype=jnp.bfloat16.
    p_cat = prepare_concat_params(weight, bias, IMG, WORD, compute_dtype=None)

    out_cat = fusion_layer(vecs, labels, p_cat, activation="tanh")
    out_cat = jax.block_until_ready(out_cat)
    ref_cat = jnp.tanh(jnp.concatenate([vecs, labels], axis=1) @ weight.T + bias)
    assert out_cat.shape == (B, IMG)
    assert jnp.allclose(out_cat, ref_cat, atol=1e-5, rtol=1e-5)

    # ---- method='add', activation='relu' ------------------------------------
    w_i = jax.random.uniform(k_wi, (IMG, IMG), minval=-bound, maxval=bound,
                             dtype=jnp.float32)
    w_t = jax.random.uniform(k_wt, (IMG, WORD), minval=-bound, maxval=bound,
                             dtype=jnp.float32)
    p_add = prepare_add_params(w_i, w_t, IMG, WORD, compute_dtype=None)

    out_add = fusion_layer(vecs, labels, p_add, activation="relu")
    out_add = jax.block_until_ready(out_add)
    ref_add = jnp.maximum(vecs @ w_i.T + labels @ w_t.T, 0.0)
    assert out_add.shape == (B, IMG)
    assert jnp.allclose(out_add, ref_add, atol=1e-5, rtol=1e-5)

    print("KERNEL_OK")
</pallas_src>

<mosaic_0001>
module attributes {stable_mosaic.version = 11 : i64} {
  func.func @_fusion_kernel(%arg0: i32, %arg1: i32, %arg2: memref<8x32xf32, #tpu.memory_space<vmem>>, %arg3: memref<8x16xf32, #tpu.memory_space<vmem>>, %arg4: memref<32x128xf32, #tpu.memory_space<vmem>>, %arg5: memref<16x128xf32, #tpu.memory_space<vmem>>, %arg6: memref<1x128xf32, #tpu.memory_space<vmem>>, %arg7: memref<8x128xf32, #tpu.memory_space<vmem>>) attributes {dimension_semantics = [#tpu.dimension_semantics<parallel>, #tpu.dimension_semantics<parallel>], iteration_bounds = array<i64: 1, 1>, scalar_prefetch = 0 : i64, scratch_operands = 0 : i64, tpu.core_type = #tpu.core_type<tc>, window_params = [{transform_indices = @transform_0, window_bounds = array<i64: 8, 32>}, {transform_indices = @transform_1, window_bounds = array<i64: 8, 16>}, {transform_indices = @transform_2, window_bounds = array<i64: 32, 128>}, {transform_indices = @transform_3, window_bounds = array<i64: 16, 128>}, {transform_indices = @transform_4, window_bounds = array<i64: 1, 128>}, {transform_indices = @transform_5, window_bounds = array<i64: 8, 128>}]} {
    %c0 = arith.constant 0 : index
    %c0_0 = arith.constant 0 : index
    %0 = vector.load %arg2[%c0, %c0_0] : memref<8x32xf32, #tpu.memory_space<vmem>>, vector<8x32xf32>
    %c0_1 = arith.constant 0 : index
    %c0_2 = arith.constant 0 : index
    %1 = vector.load %arg4[%c0_1, %c0_2] : memref<32x128xf32, #tpu.memory_space<vmem>>, vector<32x128xf32>
    %cst = arith.constant dense<0.000000e+00> : vector<8x128xf32>
    %2 = tpu.matmul %0, %1, %cst {dimension_numbers = #tpu.dot_dimension_numbers<[1], [0], [0], [1], [0, 0, 1, 1], [], []>} : vector<8x32xf32>, vector<32x128xf32>, vector<8x128xf32> -> vector<8x128xf32>
    %c0_3 = arith.constant 0 : index
    %c0_4 = arith.constant 0 : index
    %3 = vector.load %arg3[%c0_3, %c0_4] : memref<8x16xf32, #tpu.memory_space<vmem>>, vector<8x16xf32>
    %c0_5 = arith.constant 0 : index
    %c0_6 = arith.constant 0 : index
    %4 = vector.load %arg5[%c0_5, %c0_6] : memref<16x128xf32, #tpu.memory_space<vmem>>, vector<16x128xf32>
    %cst_7 = arith.constant dense<0.000000e+00> : vector<8x128xf32>
    %5 = tpu.matmul %3, %4, %cst_7 {dimension_numbers = #tpu.dot_dimension_numbers<[1], [0], [0], [1], [0, 0, 1, 1], [], []>} : vector<8x16xf32>, vector<16x128xf32>, vector<8x128xf32> -> vector<8x128xf32>
    %6 = arith.addf %2, %5 : vector<8x128xf32>
    %c0_8 = arith.constant 0 : index
    %c0_9 = arith.constant 0 : index
    %7 = vector.load %arg6[%c0_8, %c0_9] : memref<1x128xf32, #tpu.memory_space<vmem>>, vector<1x128xf32>
    %8 = vector.broadcast %7 : vector<1x128xf32> to vector<8x128xf32>
    %9 = arith.addf %6, %8 : vector<8x128xf32>
    %10 = math.tanh %9 : vector<8x128xf32>
    %c0_10 = arith.constant 0 : index
    %c0_11 = arith.constant 0 : index
    %11 = vector.load %arg7[%c0_10, %c0_11] : memref<8x128xf32, #tpu.memory_space<vmem>>, vector<8x128xf32>
    tpu.vector_store %arg7[%c0_10, %c0_11], %10 {strides = array<i32>} : memref<8x128xf32, #tpu.memory_space<vmem>>, vector<8x128xf32>,
    return
  }
  func.func @transform_0(%arg0: i32, %arg1: i32) -> (i32, i32) {
    %c0_i32 = arith.constant 0 : i32
    %c0_i32_0 = arith.constant 0 : i32
    return %arg0, %c0_i32 : i32, i32
  }
  func.func @transform_1(%arg0: i32, %arg1: i32) -> (i32, i32) {
    %c0_i32 = arith.constant 0 : i32
    %c0_i32_0 = arith.constant 0 : i32
    return %arg0, %c0_i32 : i32, i32
  }
  func.func @transform_2(%arg0: i32, %arg1: i32) -> (i32, i32) {
    %c0_i32 = arith.constant 0 : i32
    %c0_i32_0 = arith.constant 0 : i32
    return %c0_i32, %arg1 : i32, i32
  }
  func.func @transform_3(%arg0: i32, %arg1: i32) -> (i32, i32) {
    %c0_i32 = arith.constant 0 : i32
    %c0_i32_0 = arith.constant 0 : i32
    return %c0_i32, %arg1 : i32, i32
  }
  func.func @transform_4(%arg0: i32, %arg1: i32) -> (i32, i32) {
    %c0_i32 = arith.constant 0 : i32
    %c0_i32_0 = arith.constant 0 : i32
    return %c0_i32, %arg1 : i32, i32
  }
  func.func @transform_5(%arg0: i32, %arg1: i32) -> (i32, i32) {
    %c0_i32 = arith.constant 0 : i32
    return %arg0, %arg1 : i32, i32
  }
}

</mosaic_0001>

<bundles_post_ra>
// kernel: tpu_custom_call.1
= control target key start
LH: loop header
LB: loop body
LE: loop exit
PB: predicated region body
PF: predicated region fallthrough
CT: control target
= control target key end

     0   :  { %10 = vsyncpa [#allocation3], 0  ;;  %s526_s0 = inlined_call_operand.hbm [shape: f32[8,32], index: 0, kind: input, shape index: {}]   ;;  %s527_s1 = inlined_call_operand.hbm [shape: f32[8,16], index: 1, kind: input, shape index: {}]   ;;  %s528_s2 = inlined_call_operand.hbm [shape: f32[32,128], index: 2, kind: input, shape index: {}]   ;;  %s529_s3 = inlined_call_operand.hbm [shape: f32[16,128], index: 3, kind: input, shape index: {}]   ;;  %s530_s4 = inlined_call_operand.vmem [shape: f32[1,128], index: 4, kind: input, shape index: {}]   ;;  %s531_s5 = inlined_call_operand.hbm [shape: f32[8,128], index: 5, kind: output, shape index: {}]  }
   0x1   :  { %11 = vsyncpa [#allocation6], 0 }
   0x2   :  { %12 = vsyncpa [#allocation9], 0 }
   0x3   :  { %13 = vsyncpa [#allocation4], 0  ;;  %s423_s18 = smov [#allocation5]   ;;  %s424_s20 = smov [#allocation2]  }
   0x4   :  { %s30_s19 = sshll.u32 %s423_s18, 4  ;;  %s20_s21 = sshll.u32 %s424_s20, 4  ;;  %s31_s19 = int_to_ptr.vmem [resolvable:$true] %s30_s19  ;;  %s21_s21 = int_to_ptr.vmem [resolvable:$true] %s20_s21 }
   0x5   :  { %s305_s24 = scalar_lea.hbm %s527_s1, 128 }
   0x6   :  { %p306_p0 = scmp.ne.s32.totalorder %s527_s1, %s305_s24  ;;  %p309_p1 = scmp.lt.u32.totalorder %s305_s24, %s527_s1 }
   0x8   :  { %p311_p2 = pnand %p309_p1, %p306_p0 }
   0xa   :  { %314 = shalt.err (!%p311_p2)
}
   0xb   :  { %s315_s29 = scalar_lea.vmem %s31_s19, 128  ;;  %p320_p4 = scmp.lt.s32.totalorder %s31_s19, %s31_s19 }
   0xc   :  { %p316_p3 = scmp.ne.s32.totalorder %s31_s19, %s315_s29  ;;  %p321_p5 = scmp.lt.s32.totalorder %s315_s29, %s315_s29 }
   0xe   :  { %p322_p6 = por %p321_p5, %p320_p4 }
  0x10   :  { %p323_p7 = pnand %p322_p6, %p316_p3 }
  0x12   :  { %326 = shalt.err (!%p323_p7)
}
  0x13   :  { %33 = dma.hbm_to_vmem [thread:$0]  %s527_s1, 128, %s31_s19, [#allocation6]  }
  0x14   :  { %s327_s9 = scalar_lea.hbm %s526_s0, 128 }
  0x15   :  { %p328_p8 = scmp.ne.s32.totalorder %s526_s0, %s327_s9  ;;  %p331_p9 = scmp.lt.u32.totalorder %s327_s9, %s526_s0 }
  0x17   :  { %p333_p10 = pnand %p331_p9, %p328_p8 }
  0x19   :  { %336 = shalt.err (!%p333_p10)
}
  0x1a   :  { %s337_s14 = scalar_lea.vmem %s21_s21, 128  ;;  %p342_p12 = scmp.lt.s32.totalorder %s21_s21, %s21_s21 }
  0x1b   :  { %p338_p11 = scmp.ne.s32.totalorder %s21_s21, %s337_s14  ;;  %p343_p13 = scmp.lt.s32.totalorder %s337_s14, %s337_s14 }
  0x1d   :  { %p344_p0 = por %p343_p13, %p342_p12 }
  0x1f   :  { %p345_p1 = pnand %p344_p0, %p338_p11 }
  0x21   :  { %348 = shalt.err (!%p345_p1)
}
  0x22   :  { %23 = dma.hbm_to_vmem [thread:$0]  %s526_s0, 128, %s21_s21, [#allocation3]  }
  0x23   :  { %s425_s16 = smov [#allocation7]   ;;  %s349_s20 = scalar_lea.hbm %s528_s2, 512 }
  0x24   :  { %s39_s17 = sshll.u32 %s425_s16, 4  ;;  %p350_p2 = scmp.ne.s32.totalorder %s528_s2, %s349_s20  ;;  %s40_s17 = int_to_ptr.vmem [resolvable:$true] %s39_s17 }
  0x25   :  { %p353_p3 = scmp.lt.u32.totalorder %s349_s20, %s528_s2 }
  0x27   :  { %p355_p4 = pnand %p353_p3, %p350_p2 }
  0x29   :  { %358 = shalt.err (!%p355_p4)
}
  0x2a   :  { %s359_s26 = scalar_lea.vmem %s40_s17, 512  ;;  %p364_p6 = scmp.lt.s32.totalorder %s40_s17, %s40_s17 }
  0x2b   :  { %p360_p5 = scmp.ne.s32.totalorder %s40_s17, %s359_s26  ;;  %p365_p7 = scmp.lt.s32.totalorder %s359_s26, %s359_s26 }
  0x2d   :  { %p366_p8 = por %p365_p7, %p364_p6 }
  0x2f   :  { %p367_p9 = pnand %p366_p8, %p360_p5 }
  0x31   :  { %370 = shalt.err (!%p367_p9)
}
  0x32   :  { %s426_s0 = smov 128   ;;  %s427_s21 = smov 8  }
  0x33   :  { %45 = dma.hbm_to_vmem [thread:$0]  %s528_s2, 512, %s40_s17, [#allocation6], %s426_s0, %s426_s0, %s427_s21  }
  0x34   :  { %s428_s29 = smov [#allocation8]   ;;  %s371_s8 = scalar_lea.hbm %s529_s3, 256 }
  0x35   :  { %s51_s30 = sshll.u32 %s428_s29, 4  ;;  %p372_p10 = scmp.ne.s32.totalorder %s529_s3, %s371_s8  ;;  %s52_s30 = int_to_ptr.vmem [resolvable:$true] %s51_s30 }
  0x36   :  { %p375_p11 = scmp.lt.u32.totalorder %s371_s8, %s529_s3 }
  0x38   :  { %p377_p12 = pnand %p375_p11, %p372_p10 }
  0x3a   :  { %380 = shalt.err (!%p377_p12)
}
  0x3b   :  { %s381_s13 = scalar_lea.vmem %s52_s30, 256  ;;  %p386_p0 = scmp.lt.s32.totalorder %s52_s30, %s52_s30 }
  0x3c   :  { %p382_p13 = scmp.ne.s32.totalorder %s52_s30, %s381_s13  ;;  %p387_p1 = scmp.lt.s32.totalorder %s381_s13, %s381_s13 }
  0x3e   :  { %p388_p2 = por %p387_p1, %p386_p0 }
  0x40   :  { %p389_p3 = pnand %p388_p2, %p382_p13 }
  0x42   :  { %392 = shalt.err (!%p389_p3)
}
  0x43   :  { %57 = dma.hbm_to_vmem [thread:$0]  %s529_s3, 256, %s52_s30, [#allocation9], %s426_s0, %s426_s0, %s427_s21  }
  0x44   :  { %415 = dma.done.wait [#allocation3], 128  }
  0x45   :  { %416 = vsyncadd [#allocation3], 4294967168 }
  0x46   :  { %417 = dma.done.wait [#allocation6], 640  }
  0x47   :  { %418 = vsyncadd [#allocation6], 4294966656 }
  0x48   :  { %419 = dma.done.wait [#allocation9], 256  }
  0x49   :  { %420 = vsyncadd [#allocation9], 4294967040  ;;  %v429_v0 = vmov 0.0|0.0   ;;  %vm430_vm0 = vmmov 0   ;;  %v431_v1 = vmov 0.0   ;;  %v73_v2 = vld [vmem:[#allocation7] sm:$0xff] }
  0x4a   :  { %287 = vmatprep.subr.bf16.mxu1 %v429_v0  ;;  %284 = vmatprep.subr.bf16.mxu0 %v429_v0  ;;  %v74_v3 = vld [vmem:[#allocation7 + $0x8] sm:$0xff]  ;;  %v78_v4 = vld [vmem:[#allocation8] sm:$0xff]  ;;  %v75_v7 = vld [vmem:[#allocation7 + $0x10] sm:$0xff]  ;;  %vm80_vm1 = vcmask 130048   ;;  %vm154_vm2 = vcmask 261120   ;;  %s432_s15 = smov [#allocation10]  }
  0x4b   :  { %270 = vmatprep.mubr.msk.f32.mxu0 %vm430_vm0, %v431_v1  ;;  %281 = vmatprep.mubr.msk.f32.mxu1 %vm430_vm0, %v431_v1  ;;  %v288_v5 = vpack.c.bf16 %v74_v3, %v73_v2  ;;  %v79_v6 = vld [vmem:[#allocation8 + $0x8] sm:$0xff]  ;;  %v76_v8 = vld [vmem:[#allocation7 + $0x18] sm:$0xff]  ;;  %v72_v12 = vld [vmem:[#allocation2] sm:$0xff]  ;;  %s244_s16 = sshll.u32 %s432_s15, 4  ;;  %s245_s16 = int_to_ptr.vmem [resolvable:$true] %s244_s16 }
  0x4c   :  { %v285_v9 = vpack.c.bf16 %v79_v6, %v78_v4  ;;  %v291_v10 = vpack.c.bf16 %v76_v8, %v75_v7  ;;  %v77_v11 = vld [vmem:[#allocation5] sm:$0xff]  ;;  %v257_v16 = vld [vmem:[%s530_s4] ss:$0 sm:$0xff]  ;;  %s393_s17 = scalar_lea.vmem %s245_s16, 128  ;;  %p398_p5 = scmp.lt.s32.totalorder %s245_s16, %s245_s16 }
  0x4d   :  { %289 = vmatpush3.bf16.msra.mxu1 %v288_v5  ;;  %p394_p4 = scmp.ne.s32.totalorder %s245_s16, %s393_s17  ;;  %p399_p6 = scmp.lt.s32.totalorder %s393_s17, %s393_s17 }
  0x4e   :  { %286 = vmatpush3.bf16.msra.mxu0 %v285_v9  ;;  %290 = vmatprep.subr.bf16.mxu1 %v429_v0 }
  0x4f   :  { %p400_p7 = por %p399_p6, %p398_p5 }
  0x51   :  { %292 = vmatpush3.bf16.msra.mxu1 %v291_v10  ;;  %271 = vmatmul.mubr.msk.f32.vlgmr.msra.gmra.mrb[0].mxu0 %vm80_vm1, %v77_v11  ;;  %p401_p8 = pnand %p400_p7, %p394_p4 }
  0x54   :  { %282 = vmatmul.mubr.msk.f32.vlgmr.msra.gmra.mrb[0].mxu1 %vm154_vm2, %v72_v12 }
 0x124   :  { %v150_v13 = vpop.f32.mrb[0].mxu0 }
 0x125   :  { %v272_v14 = vpop.f32.mrb[1].mxu0 }
 0x127   :  { %v224_v15 = vpop.f32.mrb[0].mxu1 }
 0x128   :  { %v225_v17 = vadd.f32 %v224_v15, %v150_v13  ;;  %v283_v18 = vpop.f32.mrb[1].mxu1 }
 0x12a   :  { %v235_v19 = vadd.f32 %v257_v16, %v225_v17 }
 0x12c   :  { %303 = vtanh.f32 %v235_v19 }
 0x136   :  { %v304_v20 = vpop.eup %303 }
 0x137   :  { %237 = vst [vmem:[#allocation10] sm:$0xff] %v304_v20 }
 0x138   :  { %404 = shalt.err (!%p401_p8)
}
 0x139   :  { %s405_s4 = scalar_lea.hbm %s531_s5, 128 }
 0x13a   :  { %p406_p9 = scmp.ne.s32.totalorder %s531_s5, %s405_s4  ;;  %p409_p10 = scmp.lt.u32.totalorder %s405_s4, %s531_s5 }
 0x13c   :  { %p411_p11 = pnand %p409_p10, %p406_p9 }
 0x13e   :  { %414 = shalt.err (!%p411_p11)
}
 0x13f   :  { %247 = dma.vmem_to_hbm [thread:$0]  %s245_s16, 128, %s531_s5, [#allocation4]  }
 0x140   :  { %421 = dma.done.wait [#allocation4], 128  }
 0x141   :  { %422 = vsyncadd [#allocation4], 4294967168 }
 0x142   :  { %251 = vsyncpa [#allocation3], 1 }
 0x143   :  { %252 = vsyncpa [#allocation6], 1 }
 0x144   :  { %253 = vsyncpa [#allocation9], 1 }
 0x145   :  { %254 = vsyncpa [#allocation4], 1 }

</bundles_post_ra>
